<compile_context>
chip_gen: v5e
topology: v5e:2x2
jax: 0.10.0
libtpu: 0.0.40
codegen_flags: <defaults>
</compile_context>

<pallas_src>
import numpy as np
import jax
import jax.numpy as jnp
from jax.experimental import pallas as pl
from jax.experimental.pallas import tpu as pltpu

# Globals mirroring the PyTorch script.
DIM = 64
EXTRA = 14
FEAT = DIM + EXTRA            # 78
PAD = 128                     # lane-dense width used throughout the kernel
HIDDEN_LAYER = 4
OUTPUT_LAYER = 4
N_LAYERS = HIDDEN_LAYER + OUTPUT_LAYER + 1   # 9 stacked weight slabs
N_FINGERPRINT = 50            # fingerprint vocabulary size (module-level global in spec)
ADDUCT_DIM = 3
DESC_DIM = EXTRA - ADDUCT_DIM


# ---------------------------------------------------------------------------
# Shared forward math (used by the Pallas kernel body AND the strict reference).
# `w` / `b` may be Refs (kernel) or arrays (reference); [i] indexing is identical.
# ---------------------------------------------------------------------------
def _forward_math(xs, a, minv, pool, extras, w, b):
    # GNN message passing: bf16 MXU operands, f32 accumulation / elementwise.
    for i in range(HIDDEN_LAYER):
        hs = jnp.maximum(
            jnp.dot(xs.astype(jnp.bfloat16), w[i],
                    preferred_element_type=jnp.float32) + b[i],
            0.0)
        msg = jnp.dot(a, hs.astype(jnp.bfloat16),
                      preferred_element_type=jnp.float32)
        # update == 'mean': f32 row-wise 1/(M-1) applied AFTER the matmul; A stays
        # an exact 0/1 bf16 matrix (tighter than folding the scale into A).
        xs = xs + minv * msg

    # output == 'mean': per-molecule mean pooling (bf16 MXU operands), then the
    # "concat" with adducts/descriptors is a lane-dense add: `extras` carries them
    # at lanes 64..77 and zeros elsewhere (lanes 64..127 of xs are exactly zero).
    mv = jnp.dot(pool, xs.astype(jnp.bfloat16),
                 preferred_element_type=jnp.float32) + extras

    # Output MLP (lanes 78..127 remain exactly zero through bias-add + ReLU).
    for j in range(OUTPUT_LAYER):
        k = HIDDEN_LAYER + j
        mv = jnp.maximum(
            jnp.dot(mv.astype(jnp.bfloat16), w[k],
                    preferred_element_type=jnp.float32) + b[k],
            0.0)

    # Property head staged lane-dense: only column 0 is meaningful.
    k = HIDDEN_LAYER + OUTPUT_LAYER
    return (jnp.dot(mv.astype(jnp.bfloat16), w[k],
                    preferred_element_type=jnp.float32) + b[k])


# ---------------------------------------------------------------------------
# Fused Pallas kernel body (one grid step == one graph-batch)
# ---------------------------------------------------------------------------
def _fused_gnn_kernel(xs_ref, a_ref, minv_ref, pool_ref, extras_ref,
                      w_ref, b_ref, out_ref):
    out_ref[...] = _forward_math(
        xs_ref[...],       # (NP, 128) f32, lanes 64..127 zero
        a_ref[...],        # (NP, NP)  bf16 exact 0/1 block-diagonal adjacency
        minv_ref[...],     # (NP, 1)   f32  1/(M-1) per node (0 for pad / M==1)
        pool_ref[...],     # (B, NP)   bf16 per-molecule mean pooling
        extras_ref[...],   # (B, 128)  f32  [adducts, descriptors] at lanes 64..77
        w_ref,             # (9, 128, 128) bf16 stacked weights (VMEM-resident)
        b_ref,             # (9, 1, 128)   f32  stacked biases   (VMEM-resident)
    )


# ---------------------------------------------------------------------------
# Parameter / input preparation (lane padding, node padding, bf16 casts)
# ---------------------------------------------------------------------------
def _pad_lanes(x, target=PAD):
    return jnp.pad(x, [(0, 0)] * (x.ndim - 1) + [(0, target - x.shape[-1])])


def _pad_matrix(w, target=PAD):
    pads = ([(0, 0)] * (w.ndim - 2)
            + [(0, target - w.shape[-2]), (0, target - w.shape[-1])])
    return jnp.pad(w, pads)


def prepare_params(params):
    """Zero-pad weights/biases to 128 lanes once, stack into single slabs, cast
    matmul weights to bf16.  Embedding table gets one extra all-zero row used by
    padded nodes."""
    emb = jnp.pad(_pad_lanes(params["emb"]), ((0, 1), (0, 0)))      # (V+1, 128) f32
    w_all = jnp.concatenate([
        _pad_matrix(params["w_fp"]),                                 # layers 0..3
        _pad_matrix(params["w_out"]),                                # layers 4..7
        _pad_matrix(params["w_prop"])[None],                         # layer  8
    ], axis=0).astype(jnp.bfloat16)                                  # (9, 128, 128)
    b_all = jnp.concatenate([
        _pad_lanes(params["b_fp"]),
        _pad_lanes(params["b_out"]),
        _pad_lanes(params["b_prop"])[None],
    ], axis=0).astype(jnp.float32)                                   # (9, 1, 128)
    return {"emb": emb, "w_all": w_all, "b_all": b_all}


def prepare_activations(raw_graphs, np_nodes):
    """Pad each graph-batch to `np_nodes` nodes (multiple of 32 -> bf16 sublane pack,
    MXU-aligned K), stack into (G, ...) arrays, cast MXU-only operands to bf16."""
    fps, As, minvs, pools, extras = [], [], [], [], []
    for fingerprints, A, M, pool, adducts, descriptors in raw_graphs:
        N = A.shape[0]
        pad = np_nodes - N
        # Padded-node fingerprint index points at the extra all-zero embedding row.
        fps.append(np.pad(np.asarray(fingerprints).reshape(-1), (0, pad),
                          constant_values=N_FINGERPRINT))
        # Adjacency kept as exact 0/1 (bf16 cast is lossless for 0/1).
        As.append(np.pad(np.asarray(A, np.float32), ((0, pad), (0, pad))))
        # update == 'mean': minv = 1/(M-1).  M == 1 guarded to 0 (PyTorch would give
        # inf/NaN) — deliberate semantic deviation; padded nodes also get 0.
        Mv = np.asarray(M, np.float32).reshape(-1)
        minv = np.where(Mv > 1.0, 1.0 / np.maximum(Mv - 1.0, 1.0), 0.0)
        minvs.append(np.pad(minv, (0, pad)).reshape(np_nodes, 1))
        pools.append(np.pad(np.asarray(pool, np.float32), ((0, 0), (0, pad))))
        # Adducts + descriptors pre-placed at lanes 64..77 of a (B, 128) slab so the
        # in-kernel "concat" is a single lane-dense add.
        ex = np.concatenate([np.asarray(adducts), np.asarray(descriptors)], axis=1)
        extras.append(np.pad(ex, ((0, 0), (DIM, PAD - FEAT))))
    return (jnp.asarray(np.stack(fps), dtype=jnp.int32),        # (G, NP)
            jnp.asarray(np.stack(As), dtype=jnp.bfloat16),      # (G, NP, NP)
            jnp.asarray(np.stack(minvs), dtype=jnp.float32),    # (G, NP, 1)
            jnp.asarray(np.stack(pools), dtype=jnp.bfloat16),   # (G, B, NP)
            jnp.asarray(np.stack(extras), dtype=jnp.float32))   # (G, B, 128)


@jax.jit
def gnn_forward(kparams, fingerprints, a, minv, pool, extras):
    # Embedding lookup as an XLA gather (padded table -> lane-dense node features).
    xs0 = kparams["emb"][fingerprints]                    # (G, NP, 128) f32
    G, NP, _ = xs0.shape
    B = pool.shape[1]

    in_specs = [
        pl.BlockSpec((None, NP, PAD), lambda g: (g, 0, 0)),   # node features
        pl.BlockSpec((None, NP, NP),  lambda g: (g, 0, 0)),   # adjacency (0/1 bf16)
        pl.BlockSpec((None, NP, 1),   lambda g: (g, 0, 0)),   # minv
        pl.BlockSpec((None, B, NP),   lambda g: (g, 0, 0)),   # pooling (bf16)
        pl.BlockSpec((None, B, PAD),  lambda g: (g, 0, 0)),   # extras
        # Stacked weights/biases: constant block index -> loaded once, VMEM-resident
        # across all grid steps.
        pl.BlockSpec((N_LAYERS, PAD, PAD), lambda g: (0, 0, 0)),
        pl.BlockSpec((N_LAYERS, 1, PAD),   lambda g: (0, 0, 0)),
    ]
    out_spec = pl.BlockSpec((None, B, PAD), lambda g: (g, 0, 0))

    out = pl.pallas_call(
        _fused_gnn_kernel,
        out_shape=jax.ShapeDtypeStruct((G, B, PAD), jnp.float32),
        grid=(G,),
        in_specs=in_specs,
        out_specs=out_spec,
        compiler_params=pltpu.CompilerParams(
            # Graph-batches are independent -> shard across v7x's 2 TensorCores;
            # free no-op on v5e/v6e (1 TC).
            dimension_semantics=("parallel",)),
    )(xs0, a, minv, pool, extras, kparams["w_all"], kparams["b_all"])

    return out[:, :, :1]      # property lives in column 0 of the lane-dense slab


# ---------------------------------------------------------------------------
# Pure-JAX f32 reference (original module semantics, for loose sanity check)
# ---------------------------------------------------------------------------
def reference_f32(params, fingerprints, A, M, pool, adducts, descriptors):
    xs = params["emb"][fingerprints]
    minv = 1.0 / (M - 1.0)
    for i in range(HIDDEN_LAYER):
        hs = jax.nn.relu(xs @ params["w_fp"][i] + params["b_fp"][i])
        xs = xs + (A @ hs) * minv
    mv = jnp.concatenate([pool @ xs, adducts, descriptors], axis=1)
    for j in range(OUTPUT_LAYER):
        mv = jax.nn.relu(mv @ params["w_out"][j] + params["b_out"][j])
    return mv @ params["w_prop"] + params["b_prop"]


# ---------------------------------------------------------------------------
# Deterministic parameter / input construction
# ---------------------------------------------------------------------------
def make_params(key):
    ks = jax.random.split(key, 4)

    def linear(k, fan_in, fan_out):
        bound = 1.0 / np.sqrt(fan_in)
        kw, kb = jax.random.split(k)
        # Stored directly as (in, out) so forward does x @ W (== x @ W_torch.T).
        w = jax.random.uniform(kw, (fan_in, fan_out), jnp.float32, -bound, bound)
        b = jax.random.uniform(kb, (1, fan_out), jnp.float32, -bound, bound)
        return w, b

    emb = jax.random.normal(ks[0], (N_FINGERPRINT, DIM), jnp.float32)

    w_fp, b_fp = [], []
    for i in range(HIDDEN_LAYER):
        w, b = linear(jax.random.fold_in(ks[1], i), DIM, DIM)
        w_fp.append(w); b_fp.append(b)

    w_out, b_out = [], []
    for j in range(OUTPUT_LAYER):
        w, b = linear(jax.random.fold_in(ks[2], j), FEAT, FEAT)
        w_out.append(w); b_out.append(b)

    w_prop, b_prop = linear(ks[3], FEAT, 1)

    return {
        "emb": emb,
        "w_fp": jnp.stack(w_fp),            # (4, 64, 64)
        "b_fp": jnp.stack(b_fp),            # (4, 1, 64)
        "w_out": jnp.stack(w_out),          # (4, 78, 78)
        "b_out": jnp.stack(b_out),          # (4, 1, 78)
        "w_prop": w_prop,                   # (78, 1)
        "b_prop": b_prop,                   # (1, 1)
    }


def make_inputs(key, sizes, seed):
    """One graph-batch: B molecules, block-diagonal 0/1 adjacency, mean pooling."""
    B = len(sizes)
    N = int(sum(sizes))
    ks = jax.random.split(key, 3)

    fingerprints = np.asarray(
        jax.random.randint(ks[0], (N,), 0, N_FINGERPRINT, jnp.int32))

    rng = np.random.RandomState(seed)
    A = np.zeros((N, N), np.float32)
    off = 0
    for s in sizes:
        m = (rng.rand(s, s) > 0.5).astype(np.float32)
        m = np.triu(m, 1)
        m = m + m.T
        A[off:off + s, off:off + s] = m
        off += s

    # M = per-node molecule size (the 'mean' update divides by M - 1).
    M = np.concatenate([np.repeat(s, s) for s in sizes]).astype(np.float32)[:, None]

    # Per-molecule mean-pooling matrix (B, N).
    pool = np.zeros((B, N), np.float32)
    off = 0
    for b, s in enumerate(sizes):
        pool[b, off:off + s] = 1.0 / s
        off += s

    adducts = np.asarray(jax.random.normal(ks[1], (B, ADDUCT_DIM), jnp.float32))
    descriptors = np.asarray(jax.random.normal(ks[2], (B, DESC_DIM), jnp.float32))

    return fingerprints, A, M, pool, adducts, descriptors


if __name__ == "__main__":
    key = jax.random.PRNGKey(0)
    kp, ki = jax.random.split(key)

    params = make_params(kp)
    kparams = prepare_params(params)        # one-time pad / stack / bf16 cast

    # G=3 graph-batches, B=4 molecules each; node counts padded to NP=32.
    sizes_per_graph = [[5, 7, 6, 6], [8, 5, 4, 7], [6, 6, 6, 6]]
    NP = 32
    raw = [make_inputs(jax.random.fold_in(ki, g), s, seed=g)
           for g, s in enumerate(sizes_per_graph)]
    fingerprints, a, minv, pool, extras = prepare_activations(raw, NP)

    props = gnn_forward(kparams, fingerprints, a, minv, pool, extras)
    props = jax.block_until_ready(props)
    G, B = len(sizes_per_graph), len(sizes_per_graph[0])
    assert props.shape == (G, B, 1)

    # Strict check: identical numerics (bf16 MXU operands, f32 accumulation) in pure JAX.
    xs0 = kparams["emb"][fingerprints]
    for g in range(G):
        strict = _forward_math(xs0[g], a[g], minv[g], pool[g], extras[g],
                               kparams["w_all"], kparams["b_all"])[:, :1]
        np.testing.assert_allclose(np.asarray(props[g]), np.asarray(strict),
                                   rtol=1e-4, atol=1e-4)

    # Loose check against the original full-f32 semantics (bf16 drift only).
    for g in range(G):
        fp_g, A_g, M_g, pool_g, ad_g, de_g = raw[g]
        ref = reference_f32(params, fp_g, A_g, M_g, pool_g, ad_g, de_g)
        np.testing.assert_allclose(np.asarray(props[g]), np.asarray(ref),
                                   rtol=1e-1, atol=1e-1)

    print("KERNEL_OK")
</pallas_src>

<mosaic_0001>
module attributes {stable_mosaic.version = 11 : i64} {
  func.func @_fused_gnn_kernel(%arg0: i32, %arg1: memref<1x32x128xf32, #tpu.memory_space<vmem>>, %arg2: memref<1x32x32xbf16, #tpu.memory_space<vmem>>, %arg3: memref<1x32x1xf32, #tpu.memory_space<vmem>>, %arg4: memref<1x4x32xbf16, #tpu.memory_space<vmem>>, %arg5: memref<1x4x128xf32, #tpu.memory_space<vmem>>, %arg6: memref<9x128x128xbf16, #tpu.memory_space<vmem>>, %arg7: memref<9x1x128xf32, #tpu.memory_space<vmem>>, %arg8: memref<1x4x128xf32, #tpu.memory_space<vmem>>) attributes {dimension_semantics = [#tpu.dimension_semantics<parallel>], iteration_bounds = array<i64: 3>, scalar_prefetch = 0 : i64, scratch_operands = 0 : i64, tpu.core_type = #tpu.core_type<tc>, window_params = [{transform_indices = @transform_0, window_bounds = array<i64: 1, 32, 128>}, {transform_indices = @transform_1, window_bounds = array<i64: 1, 32, 32>}, {transform_indices = @transform_2, window_bounds = array<i64: 1, 32, 1>}, {transform_indices = @transform_3, window_bounds = array<i64: 1, 4, 32>}, {transform_indices = @transform_4, window_bounds = array<i64: 1, 4, 128>}, {pipeline_mode = #tpu.pipeline_mode<synchronous>, transform_indices = @transform_5, window_bounds = array<i64: 9, 128, 128>}, {pipeline_mode = #tpu.pipeline_mode<synchronous>, transform_indices = @transform_6, window_bounds = array<i64: 9, 1, 128>}, {transform_indices = @transform_7, window_bounds = array<i64: 1, 4, 128>}]} {
    %c0 = arith.constant 0 : index
    %c0_0 = arith.constant 0 : index
    %c0_1 = arith.constant 0 : index
    %0 = vector.load %arg1[%c0, %c0_0, %c0_1] : memref<1x32x128xf32, #tpu.memory_space<vmem>>, vector<1x32x128xf32>
    %1 = vector.shape_cast %0 : vector<1x32x128xf32> to vector<32x128xf32>
    %c0_2 = arith.constant 0 : index
    %c0_3 = arith.constant 0 : index
    %c0_4 = arith.constant 0 : index
    %2 = vector.load %arg2[%c0_2, %c0_3, %c0_4] : memref<1x32x32xbf16, #tpu.memory_space<vmem>>, vector<1x32x32xbf16>
    %3 = vector.shape_cast %2 : vector<1x32x32xbf16> to vector<32x32xbf16>
    %c0_5 = arith.constant 0 : index
    %c0_6 = arith.constant 0 : index
    %c0_7 = arith.constant 0 : index
    %4 = vector.load %arg3[%c0_5, %c0_6, %c0_7] : memref<1x32x1xf32, #tpu.memory_space<vmem>>, vector<1x32x1xf32>
    %5 = vector.shape_cast %4 : vector<1x32x1xf32> to vector<32x1xf32>
    %c0_8 = arith.constant 0 : index
    %c0_9 = arith.constant 0 : index
    %c0_10 = arith.constant 0 : index
    %6 = vector.load %arg4[%c0_8, %c0_9, %c0_10] : memref<1x4x32xbf16, #tpu.memory_space<vmem>>, vector<1x4x32xbf16>
    %7 = vector.shape_cast %6 : vector<1x4x32xbf16> to vector<4x32xbf16>
    %c0_11 = arith.constant 0 : index
    %c0_12 = arith.constant 0 : index
    %c0_13 = arith.constant 0 : index
    %8 = vector.load %arg5[%c0_11, %c0_12, %c0_13] : memref<1x4x128xf32, #tpu.memory_space<vmem>>, vector<1x4x128xf32>
    %9 = vector.shape_cast %8 : vector<1x4x128xf32> to vector<4x128xf32>
    %10 = arith.truncf %1 : vector<32x128xf32> to vector<32x128xbf16>
    %c0_14 = arith.constant 0 : index
    %c0_15 = arith.constant 0 : index
    %c0_16 = arith.constant 0 : index
    %11 = vector.load %arg6[%c0_14, %c0_15, %c0_16] : memref<9x128x128xbf16, #tpu.memory_space<vmem>>, vector<1x128x128xbf16>
    %12 = vector.shape_cast %11 : vector<1x128x128xbf16> to vector<128x128xbf16>
    %cst = arith.constant dense<0.000000e+00> : vector<32x128xf32>
    %13 = tpu.matmul %10, %12, %cst {dimension_numbers = #tpu.dot_dimension_numbers<[1], [0], [0], [1], [0, 0, 1, 1], [], []>} : vector<32x128xbf16>, vector<128x128xbf16>, vector<32x128xf32> -> vector<32x128xf32>
    %c0_17 = arith.constant 0 : index
    %c0_18 = arith.constant 0 : index
    %c0_19 = arith.constant 0 : index
    %14 = vector.load %arg7[%c0_17, %c0_18, %c0_19] : memref<9x1x128xf32, #tpu.memory_space<vmem>>, vector<1x1x128xf32>
    %15 = vector.shape_cast %14 : vector<1x1x128xf32> to vector<1x128xf32>
    %16 = vector.broadcast %15 : vector<1x128xf32> to vector<32x128xf32>
    %17 = arith.addf %13, %16 : vector<32x128xf32>
    %cst_20 = arith.constant 0.000000e+00 : f32
    %18 = vector.broadcast %cst_20 : f32 to vector<32x128xf32>
    %19 = arith.maximumf %17, %18 : vector<32x128xf32>
    %20 = arith.truncf %19 : vector<32x128xf32> to vector<32x128xbf16>
    %cst_21 = arith.constant dense<0.000000e+00> : vector<32x128xf32>
    %21 = tpu.matmul %3, %20, %cst_21 {dimension_numbers = #tpu.dot_dimension_numbers<[1], [0], [0], [1], [0, 0, 1, 1], [], []>} : vector<32x32xbf16>, vector<32x128xbf16>, vector<32x128xf32> -> vector<32x128xf32>
    %22 = vector.broadcast %5 : vector<32x1xf32> to vector<32x128xf32>
    %23 = arith.mulf %22, %21 : vector<32x128xf32>
    %24 = arith.addf %1, %23 : vector<32x128xf32>
    %25 = arith.truncf %24 : vector<32x128xf32> to vector<32x128xbf16>
    %c1 = arith.constant 1 : index
    %c0_22 = arith.constant 0 : index
    %c0_23 = arith.constant 0 : index
    %26 = vector.load %arg6[%c1, %c0_22, %c0_23] : memref<9x128x128xbf16, #tpu.memory_space<vmem>>, vector<1x128x128xbf16>
    %27 = vector.shape_cast %26 : vector<1x128x128xbf16> to vector<128x128xbf16>
    %cst_24 = arith.constant dense<0.000000e+00> : vector<32x128xf32>
    %28 = tpu.matmul %25, %27, %cst_24 {dimension_numbers = #tpu.dot_dimension_numbers<[1], [0], [0], [1], [0, 0, 1, 1], [], []>} : vector<32x128xbf16>, vector<128x128xbf16>, vector<32x128xf32> -> vector<32x128xf32>
    %c1_25 = arith.constant 1 : index
    %c0_26 = arith.constant 0 : index
    %c0_27 = arith.constant 0 : index
    %29 = vector.load %arg7[%c1_25, %c0_26, %c0_27] : memref<9x1x128xf32, #tpu.memory_space<vmem>>, vector<1x1x128xf32>
    %30 = vector.shape_cast %29 : vector<1x1x128xf32> to vector<1x128xf32>
    %31 = vector.broadcast %30 : vector<1x128xf32> to vector<32x128xf32>
    %32 = arith.addf %28, %31 : vector<32x128xf32>
    %cst_28 = arith.constant 0.000000e+00 : f32
    %33 = vector.broadcast %cst_28 : f32 to vector<32x128xf32>
    %34 = arith.maximumf %32, %33 : vector<32x128xf32>
    %35 = arith.truncf %34 : vector<32x128xf32> to vector<32x128xbf16>
    %cst_29 = arith.constant dense<0.000000e+00> : vector<32x128xf32>
    %36 = tpu.matmul %3, %35, %cst_29 {dimension_numbers = #tpu.dot_dimension_numbers<[1], [0], [0], [1], [0, 0, 1, 1], [], []>} : vector<32x32xbf16>, vector<32x128xbf16>, vector<32x128xf32> -> vector<32x128xf32>
    %37 = vector.broadcast %5 : vector<32x1xf32> to vector<32x128xf32>
    %38 = arith.mulf %37, %36 : vector<32x128xf32>
    %39 = arith.addf %24, %38 : vector<32x128xf32>
    %40 = arith.truncf %39 : vector<32x128xf32> to vector<32x128xbf16>
    %c2 = arith.constant 2 : index
    %c0_30 = arith.constant 0 : index
    %c0_31 = arith.constant 0 : index
    %41 = vector.load %arg6[%c2, %c0_30, %c0_31] : memref<9x128x128xbf16, #tpu.memory_space<vmem>>, vector<1x128x128xbf16>
    %42 = vector.shape_cast %41 : vector<1x128x128xbf16> to vector<128x128xbf16>
    %cst_32 = arith.constant dense<0.000000e+00> : vector<32x128xf32>
    %43 = tpu.matmul %40, %42, %cst_32 {dimension_numbers = #tpu.dot_dimension_numbers<[1], [0], [0], [1], [0, 0, 1, 1], [], []>} : vector<32x128xbf16>, vector<128x128xbf16>, vector<32x128xf32> -> vector<32x128xf32>
    %c2_33 = arith.constant 2 : index
    %c0_34 = arith.constant 0 : index
    %c0_35 = arith.constant 0 : index
    %44 = vector.load %arg7[%c2_33, %c0_34, %c0_35] : memref<9x1x128xf32, #tpu.memory_space<vmem>>, vector<1x1x128xf32>
    %45 = vector.shape_cast %44 : vector<1x1x128xf32> to vector<1x128xf32>
    %46 = vector.broadcast %45 : vector<1x128xf32> to vector<32x128xf32>
    %47 = arith.addf %43, %46 : vector<32x128xf32>
    %cst_36 = arith.constant 0.000000e+00 : f32
    %48 = vector.broadcast %cst_36 : f32 to vector<32x128xf32>
    %49 = arith.maximumf %47, %48 : vector<32x128xf32>
    %50 = arith.truncf %49 : vector<32x128xf32> to vector<32x128xbf16>
    %cst_37 = arith.constant dense<0.000000e+00> : vector<32x128xf32>
    %51 = tpu.matmul %3, %50, %cst_37 {dimension_numbers = #tpu.dot_dimension_numbers<[1], [0], [0], [1], [0, 0, 1, 1], [], []>} : vector<32x32xbf16>, vector<32x128xbf16>, vector<32x128xf32> -> vector<32x128xf32>
    %52 = vector.broadcast %5 : vector<32x1xf32> to vector<32x128xf32>
    %53 = arith.mulf %52, %51 : vector<32x128xf32>
    %54 = arith.addf %39, %53 : vector<32x128xf32>
    %55 = arith.truncf %54 : vector<32x128xf32> to vector<32x128xbf16>
    %c3 = arith.constant 3 : index
    %c0_38 = arith.constant 0 : index
    %c0_39 = arith.constant 0 : index
    %56 = vector.load %arg6[%c3, %c0_38, %c0_39] : memref<9x128x128xbf16, #tpu.memory_space<vmem>>, vector<1x128x128xbf16>
    %57 = vector.shape_cast %56 : vector<1x128x128xbf16> to vector<128x128xbf16>
    %cst_40 = arith.constant dense<0.000000e+00> : vector<32x128xf32>
    %58 = tpu.matmul %55, %57, %cst_40 {dimension_numbers = #tpu.dot_dimension_numbers<[1], [0], [0], [1], [0, 0, 1, 1], [], []>} : vector<32x128xbf16>, vector<128x128xbf16>, vector<32x128xf32> -> vector<32x128xf32>
    %c3_41 = arith.constant 3 : index
    %c0_42 = arith.constant 0 : index
    %c0_43 = arith.constant 0 : index
    %59 = vector.load %arg7[%c3_41, %c0_42, %c0_43] : memref<9x1x128xf32, #tpu.memory_space<vmem>>, vector<1x1x128xf32>
    %60 = vector.shape_cast %59 : vector<1x1x128xf32> to vector<1x128xf32>
    %61 = vector.broadcast %60 : vector<1x128xf32> to vector<32x128xf32>
    %62 = arith.addf %58, %61 : vector<32x128xf32>
    %cst_44 = arith.constant 0.000000e+00 : f32
    %63 = vector.broadcast %cst_44 : f32 to vector<32x128xf32>
    %64 = arith.maximumf %62, %63 : vector<32x128xf32>
    %65 = arith.truncf %64 : vector<32x128xf32> to vector<32x128xbf16>
    %cst_45 = arith.constant dense<0.000000e+00> : vector<32x128xf32>
    %66 = tpu.matmul %3, %65, %cst_45 {dimension_numbers = #tpu.dot_dimension_numbers<[1], [0], [0], [1], [0, 0, 1, 1], [], []>} : vector<32x32xbf16>, vector<32x128xbf16>, vector<32x128xf32> -> vector<32x128xf32>
    %67 = vector.broadcast %5 : vector<32x1xf32> to vector<32x128xf32>
    %68 = arith.mulf %67, %66 : vector<32x128xf32>
    %69 = arith.addf %54, %68 : vector<32x128xf32>
    %70 = arith.truncf %69 : vector<32x128xf32> to vector<32x128xbf16>
    %cst_46 = arith.constant dense<0.000000e+00> : vector<4x128xf32>
    %71 = tpu.matmul %7, %70, %cst_46 {dimension_numbers = #tpu.dot_dimension_numbers<[1], [0], [0], [1], [0, 0, 1, 1], [], []>} : vector<4x32xbf16>, vector<32x128xbf16>, vector<4x128xf32> -> vector<4x128xf32>
    %72 = arith.addf %71, %9 : vector<4x128xf32>
    %73 = arith.truncf %72 : vector<4x128xf32> to vector<4x128xbf16>
    %c4 = arith.constant 4 : index
    %c0_47 = arith.constant 0 : index
    %c0_48 = arith.constant 0 : index
    %74 = vector.load %arg6[%c4, %c0_47, %c0_48] : memref<9x128x128xbf16, #tpu.memory_space<vmem>>, vector<1x128x128xbf16>
    %75 = vector.shape_cast %74 : vector<1x128x128xbf16> to vector<128x128xbf16>
    %cst_49 = arith.constant dense<0.000000e+00> : vector<4x128xf32>
    %76 = tpu.matmul %73, %75, %cst_49 {dimension_numbers = #tpu.dot_dimension_numbers<[1], [0], [0], [1], [0, 0, 1, 1], [], []>} : vector<4x128xbf16>, vector<128x128xbf16>, vector<4x128xf32> -> vector<4x128xf32>
    %c4_50 = arith.constant 4 : index
    %c0_51 = arith.constant 0 : index
    %c0_52 = arith.constant 0 : index
    %77 = vector.load %arg7[%c4_50, %c0_51, %c0_52] : memref<9x1x128xf32, #tpu.memory_space<vmem>>, vector<1x1x128xf32>
    %78 = vector.shape_cast %77 : vector<1x1x128xf32> to vector<1x128xf32>
    %79 = vector.broadcast %78 : vector<1x128xf32> to vector<4x128xf32>
    %80 = arith.addf %76, %79 : vector<4x128xf32>
    %cst_53 = arith.constant 0.000000e+00 : f32
    %81 = vector.broadcast %cst_53 : f32 to vector<4x128xf32>
    %82 = arith.maximumf %80, %81 : vector<4x128xf32>
    %83 = arith.truncf %82 : vector<4x128xf32> to vector<4x128xbf16>
    %c5 = arith.constant 5 : index
    %c0_54 = arith.constant 0 : index
    %c0_55 = arith.constant 0 : index
    %84 = vector.load %arg6[%c5, %c0_54, %c0_55] : memref<9x128x128xbf16, #tpu.memory_space<vmem>>, vector<1x128x128xbf16>
    %85 = vector.shape_cast %84 : vector<1x128x128xbf16> to vector<128x128xbf16>
    %cst_56 = arith.constant dense<0.000000e+00> : vector<4x128xf32>
    %86 = tpu.matmul %83, %85, %cst_56 {dimension_numbers = #tpu.dot_dimension_numbers<[1], [0], [0], [1], [0, 0, 1, 1], [], []>} : vector<4x128xbf16>, vector<128x128xbf16>, vector<4x128xf32> -> vector<4x128xf32>
    %c5_57 = arith.constant 5 : index
    %c0_58 = arith.constant 0 : index
    %c0_59 = arith.constant 0 : index
    %87 = vector.load %arg7[%c5_57, %c0_58, %c0_59] : memref<9x1x128xf32, #tpu.memory_space<vmem>>, vector<1x1x128xf32>
    %88 = vector.shape_cast %87 : vector<1x1x128xf32> to vector<1x128xf32>
    %89 = vector.broadcast %88 : vector<1x128xf32> to vector<4x128xf32>
    %90 = arith.addf %86, %89 : vector<4x128xf32>
    %cst_60 = arith.constant 0.000000e+00 : f32
    %91 = vector.broadcast %cst_60 : f32 to vector<4x128xf32>
    %92 = arith.maximumf %90, %91 : vector<4x128xf32>
    %93 = arith.truncf %92 : vector<4x128xf32> to vector<4x128xbf16>
    %c6 = arith.constant 6 : index
    %c0_61 = arith.constant 0 : index
    %c0_62 = arith.constant 0 : index
    %94 = vector.load %arg6[%c6, %c0_61, %c0_62] : memref<9x128x128xbf16, #tpu.memory_space<vmem>>, vector<1x128x128xbf16>
    %95 = vector.shape_cast %94 : vector<1x128x128xbf16> to vector<128x128xbf16>
    %cst_63 = arith.constant dense<0.000000e+00> : vector<4x128xf32>
    %96 = tpu.matmul %93, %95, %cst_63 {dimension_numbers = #tpu.dot_dimension_numbers<[1], [0], [0], [1], [0, 0, 1, 1], [], []>} : vector<4x128xbf16>, vector<128x128xbf16>, vector<4x128xf32> -> vector<4x128xf32>
    %c6_64 = arith.constant 6 : index
    %c0_65 = arith.constant 0 : index
    %c0_66 = arith.constant 0 : index
    %97 = vector.load %arg7[%c6_64, %c0_65, %c0_66] : memref<9x1x128xf32, #tpu.memory_space<vmem>>, vector<1x1x128xf32>
    %98 = vector.shape_cast %97 : vector<1x1x128xf32> to vector<1x128xf32>
    %99 = vector.broadcast %98 : vector<1x128xf32> to vector<4x128xf32>
    %100 = arith.addf %96, %99 : vector<4x128xf32>
    %cst_67 = arith.constant 0.000000e+00 : f32
    %101 = vector.broadcast %cst_67 : f32 to vector<4x128xf32>
    %102 = arith.maximumf %100, %101 : vector<4x128xf32>
    %103 = arith.truncf %102 : vector<4x128xf32> to vector<4x128xbf16>
    %c7 = arith.constant 7 : index
    %c0_68 = arith.constant 0 : index
    %c0_69 = arith.constant 0 : index
    %104 = vector.load %arg6[%c7, %c0_68, %c0_69] : memref<9x128x128xbf16, #tpu.memory_space<vmem>>, vector<1x128x128xbf16>
    %105 = vector.shape_cast %104 : vector<1x128x128xbf16> to vector<128x128xbf16>
    %cst_70 = arith.constant dense<0.000000e+00> : vector<4x128xf32>
    %106 = tpu.matmul %103, %105, %cst_70 {dimension_numbers = #tpu.dot_dimension_numbers<[1], [0], [0], [1], [0, 0, 1, 1], [], []>} : vector<4x128xbf16>, vector<128x128xbf16>, vector<4x128xf32> -> vector<4x128xf32>
    %c7_71 = arith.constant 7 : index
    %c0_72 = arith.constant 0 : index
    %c0_73 = arith.constant 0 : index
    %107 = vector.load %arg7[%c7_71, %c0_72, %c0_73] : memref<9x1x128xf32, #tpu.memory_space<vmem>>, vector<1x1x128xf32>
    %108 = vector.shape_cast %107 : vector<1x1x128xf32> to vector<1x128xf32>
    %109 = vector.broadcast %108 : vector<1x128xf32> to vector<4x128xf32>
    %110 = arith.addf %106, %109 : vector<4x128xf32>
    %cst_74 = arith.constant 0.000000e+00 : f32
    %111 = vector.broadcast %cst_74 : f32 to vector<4x128xf32>
    %112 = arith.maximumf %110, %111 : vector<4x128xf32>
    %113 = arith.truncf %112 : vector<4x128xf32> to vector<4x128xbf16>
    %c8 = arith.constant 8 : index
    %c0_75 = arith.constant 0 : index
    %c0_76 = arith.constant 0 : index
    %114 = vector.load %arg6[%c8, %c0_75, %c0_76] : memref<9x128x128xbf16, #tpu.memory_space<vmem>>, vector<1x128x128xbf16>
    %115 = vector.shape_cast %114 : vector<1x128x128xbf16> to vector<128x128xbf16>
    %cst_77 = arith.constant dense<0.000000e+00> : vector<4x128xf32>
    %116 = tpu.matmul %113, %115, %cst_77 {dimension_numbers = #tpu.dot_dimension_numbers<[1], [0], [0], [1], [0, 0, 1, 1], [], []>} : vector<4x128xbf16>, vector<128x128xbf16>, vector<4x128xf32> -> vector<4x128xf32>
    %c8_78 = arith.constant 8 : index
    %c0_79 = arith.constant 0 : index
    %c0_80 = arith.constant 0 : index
    %117 = vector.load %arg7[%c8_78, %c0_79, %c0_80] : memref<9x1x128xf32, #tpu.memory_space<vmem>>, vector<1x1x128xf32>
    %118 = vector.shape_cast %117 : vector<1x1x128xf32> to vector<1x128xf32>
    %119 = vector.broadcast %118 : vector<1x128xf32> to vector<4x128xf32>
    %120 = arith.addf %116, %119 : vector<4x128xf32>
    %c0_81 = arith.constant 0 : index
    %c0_82 = arith.constant 0 : index
    %c0_83 = arith.constant 0 : index
    %121 = vector.load %arg8[%c0_81, %c0_82, %c0_83] : memref<1x4x128xf32, #tpu.memory_space<vmem>>, vector<1x4x128xf32>
    %122 = vector.shape_cast %121 : vector<1x4x128xf32> to vector<4x128xf32>
    %123 = vector.shape_cast %120 : vector<4x128xf32> to vector<1x4x128xf32>
    tpu.vector_store %arg8[%c0_81, %c0_82, %c0_83], %123 {strides = array<i32>} : memref<1x4x128xf32, #tpu.memory_space<vmem>>, vector<1x4x128xf32>,
    return
  }
  func.func @transform_0(%arg0: i32) -> (i32, i32, i32) {
    %c0_i32 = arith.constant 0 : i32
    %c0_i32_0 = arith.constant 0 : i32
    %c0_i32_1 = arith.constant 0 : i32
    return %arg0, %c0_i32, %c0_i32_0 : i32, i32, i32
  }
  func.func @transform_1(%arg0: i32) -> (i32, i32, i32) {
    %c0_i32 = arith.constant 0 : i32
    %c0_i32_0 = arith.constant 0 : i32
    %c0_i32_1 = arith.constant 0 : i32
    return %arg0, %c0_i32, %c0_i32_0 : i32, i32, i32
  }
  func.func @transform_2(%arg0: i32) -> (i32, i32, i32) {
    %c0_i32 = arith.constant 0 : i32
    %c0_i32_0 = arith.constant 0 : i32
    %c0_i32_1 = arith.constant 0 : i32
    return %arg0, %c0_i32, %c0_i32_0 : i32, i32, i32
  }
  func.func @transform_3(%arg0: i32) -> (i32, i32, i32) {
    %c0_i32 = arith.constant 0 : i32
    %c0_i32_0 = arith.constant 0 : i32
    %c0_i32_1 = arith.constant 0 : i32
    return %arg0, %c0_i32, %c0_i32_0 : i32, i32, i32
  }
  func.func @transform_4(%arg0: i32) -> (i32, i32, i32) {
    %c0_i32 = arith.constant 0 : i32
    %c0_i32_0 = arith.constant 0 : i32
    %c0_i32_1 = arith.constant 0 : i32
    return %arg0, %c0_i32, %c0_i32_0 : i32, i32, i32
  }
  func.func @transform_5(%arg0: i32) -> (i32, i32, i32) {
    %c0_i32 = arith.constant 0 : i32
    %c0_i32_0 = arith.constant 0 : i32
    %c0_i32_1 = arith.constant 0 : i32
    %c0_i32_2 = arith.constant 0 : i32
    return %c0_i32, %c0_i32_0, %c0_i32_1 : i32, i32, i32
  }
  func.func @transform_6(%arg0: i32) -> (i32, i32, i32) {
    %c0_i32 = arith.constant 0 : i32
    %c0_i32_0 = arith.constant 0 : i32
    %c0_i32_1 = arith.constant 0 : i32
    %c0_i32_2 = arith.constant 0 : i32
    return %c0_i32, %c0_i32_0, %c0_i32_1 : i32, i32, i32
  }
  func.func @transform_7(%arg0: i32) -> (i32, i32, i32) {
    %c0_i32 = arith.constant 0 : i32
    %c0_i32_0 = arith.constant 0 : i32
    %c0_i32_1 = arith.constant 0 : i32
    return %arg0, %c0_i32, %c0_i32_0 : i32, i32, i32
  }
}

</mosaic_0001>

<bundles_post_ra>
// kernel: gnn_forward.1
= control target key start
LH: loop header
LB: loop body
LE: loop exit
PB: predicated region body
PF: predicated region fallthrough
CT: control target
= control target key end

     0   :  { %s2044_s24 = smov 0   ;;  %s2387_s0 = inlined_call_operand.vmem [shape: f32[3,32,128], index: 0, kind: input, shape index: {}]   ;;  %s2388_s1 = inlined_call_operand.vmem [shape: bf16[3,32,32], index: 1, kind: input, shape index: {}]   ;;  %s2389_s2 = inlined_call_operand.vmem [shape: f32[3,32,1], index: 2, kind: input, shape index: {}]   ;;  %s2390_s3 = inlined_call_operand.vmem [shape: bf16[3,4,32], index: 3, kind: input, shape index: {}]   ;;  %s2391_s4 = inlined_call_operand.vmem [shape: f32[3,4,128], index: 4, kind: input, shape index: {}]   ;;  %s2392_s5 = inlined_call_operand.vmem [shape: bf16[9,128,128], index: 5, kind: input, shape index: {}]   ;;  %s2393_s6 = inlined_call_operand.vmem [shape: f32[9,1,128], index: 6, kind: input, shape index: {}]   ;;  %s2394_s7 = inlined_call_operand.vmem [shape: f32[3,4,128], index: 7, kind: output, shape index: {}]  }
   0x1 LB: > { %s1441_s25 = sadd.s32 4294967295, %s2001_s24   ;;  %p1445_p0 = scmp.ge.s32.totalorder %s2001_s24, 1  ;;  %s2001_s24 = sphi %s2044_s24, %s17_s24  }
   0x2   : > { %p275_p1 = scmp.lt.s32.totalorder %s2001_s24, 4 }
   0x4   : > { %p276_p2 = pnand %p1445_p0, %p275_p1 }
   0x5   : > { %p324_p3 = scmp.lt.s32.totalorder (!%p276_p2), %s1441_s25, 2 }
   0x6   : > { %279 = sbr.rel (%p276_p2) target bundleno = 2112 (0x840), region = 48 }
   0xb   : > { %v1910_v0 = vld [vmem:[%s2392_s5 + $0x38] sm:$0xff]  ;;  %v1909_v1 = vld [vmem:[%s2392_s5 + $0x30] sm:$0xff]  ;;  %v1908_v2 = vld [vmem:[%s2392_s5 + $0x28] sm:$0xff]  ;;  %s2396_s25 = smov (!%p324_p3, %s1441_s25), 2  ;;  %v2003_v16 = vmov 0   ;;  %vm471_vm0 = vcmask 261120  }
   0xc   : > { %436 = vmatpush.bf16.msra.mxu0 %v1910_v0  ;;  %v1907_v3 = vld [vmem:[%s2392_s5 + $0x20] sm:$0xff]  ;;  %v1906_v4 = vld [vmem:[%s2392_s5 + $0x18] sm:$0xff]  ;;  %v1905_v5 = vld [vmem:[%s2392_s5 + $0x10] sm:$0xff]  ;;  %s1898_s15 = sshll.u32 %s2396_s25, 5  ;;  %1984 = vset.pattern.permute.xlu0 %v2003_v16  ;;  %s1899_s11 = sshll.u32 %s2396_s25, 4 }
   0xd   : > { %v1904_v6 = vld [vmem:[%s2392_s5 + $0x8] sm:$0xff]  ;;  %s328_s20 = scalar_lea.vmem %s2387_s0, %s1898_s15  ;;  %v1903_v7 = vld [vmem:[%s2392_s5] sm:$0xff]  ;;  %s338_s27 = scalar_lea.vmem %s2389_s2, %s1898_s15  ;;  %1985 = vset.pattern.permute.xlu1 %v2003_v16  ;;  %v1918_v22 = vld [vmem:[%s2392_s5 + $0x78] sm:$0xff] }
   0xe   : > { %v2082_v8 = vld [vmem:[%s328_s20] sm:$0xff]  ;;  %v2084_v9 = vld [vmem:[%s328_s20 + $0x8] sm:$0xff]  ;;  %v2088_v11 = vld [vmem:[%s328_s20 + $0x10] sm:$0xff]  ;;  %597 = vmatpush.bf16.msra.mxu2 %v1918_v22  ;;  %s333_s16 = scalar_lea.vmem %s2388_s1, %s1899_s11  ;;  %s1453_s11 = sshll.u32 %s2396_s25, 2 }
   0xf   : > { %v366_v10 = vpack.c.bf16 %v2084_v9, %v2082_v8  ;;  %v2090_v12 = vld [vmem:[%s328_s20 + $0x18] sm:$0xff]  ;;  %v360_v15 = vld [vmem:[%s338_s27] sm:$0xff]  ;;  %v361_v18 = vld [vmem:[%s338_s27 + $0x8] sm:$0xff]  ;;  %s350_s21 = scalar_lea.vmem %s2394_s7, %s1453_s11 }
  0x10   : > { %437 = vmatpush.bf16.msra.mxu0 %v1909_v1  ;;  %v367_v13 = vpack.c.bf16 %v2090_v12, %v2088_v11  ;;  %499 = vperm.xlu0 %1984, %v360_v15   ;;  %v1986_v20 = vld [vmem:[%s2393_s6] ss:$0 sm:$0xff]  ;;  %v362_v21 = vld [vmem:[%s338_s27 + $0x10] sm:$0xff]  ;;  %v363_v31 = vld [vmem:[%s338_s27 + $0x18] sm:$0xff] }
  0x11   : > { %509 = vperm.xlu1 %1985, %v362_v21   ;;  %v1917_v25 = vld [vmem:[%s2392_s5 + $0x70] sm:$0xff]  ;;  %v1916_v32 = vld [vmem:[%s2392_s5 + $0x68] sm:$0xff]  ;;  %v2113_v37 = vld [vmem:[%s333_s16] sm:$0xff] }
  0x12   : > { %598 = vmatpush.bf16.msra.mxu2 %v1917_v25  ;;  %v2117_v38 = vld [vmem:[%s333_s16 + $0x8] sm:$0xff]  ;;  %v1915_v39 = vld [vmem:[%s2392_s5 + $0x60] sm:$0xff]  ;;  %v1914_v40 = vld [vmem:[%s2392_s5 + $0x58] sm:$0xff]  ;;  %s1452_s16 = sshll.u32 %s2396_s25, 1 }
  0x13   : > { %v1913_v41 = vld [vmem:[%s2392_s5 + $0x50] sm:$0xff]  ;;  %v1912_v42 = vld [vmem:[%s2392_s5 + $0x48] sm:$0xff]  ;;  %v1911_v43 = vld [vmem:[%s2392_s5 + $0x40] sm:$0xff]  ;;  %s342_s19 = scalar_lea.vmem %s2390_s3, %s1452_s16  ;;  %s346_s16 = scalar_lea.vmem %s2391_s4, %s1453_s11 }
  0x14   : > { %438 = vmatpush.bf16.msra.mxu0 %v1908_v2  ;;  %v1987_v1 = vld [vmem:[%s2393_s6 + $0x1] ss:$0 sm:$0xff]  ;;  %v1926_v2 = vld [vmem:[%s2392_s5 + $0xb8] sm:$0xff] }
  0x15   : > { %v1923_v15 = vld [vmem:[%s2392_s5 + $0xa0] sm:$0xff] }
  0x16   : > { %599 = vmatpush.bf16.msra.mxu2 %v1916_v32 }
  0x18   : > { %439 = vmatpush.bf16.msra.mxu0 %v1907_v3  ;;  %504 = vperm.xlu0 %1984, %v361_v18   ;;  %v1921_v18 = vld [vmem:[%s2392_s5 + $0x90] sm:$0xff] }
  0x19   : > { %514 = vperm.xlu1 %1985, %v363_v31  }
  0x1a   : > { %600 = vmatpush.bf16.msra.mxu2 %v1915_v39 }
  0x1c   : > { %440 = vmatpush.bf16.msra.mxu0 %v1906_v4 }
  0x1e   : > { %601 = vmatpush.bf16.msra.mxu2 %v1914_v40  ;;  %v1988_v40 = vld [vmem:[%s2393_s6 + $0x2] ss:$0 sm:$0xff] }
  0x20   : > { %441 = vmatpush.bf16.msra.mxu0 %v1905_v5  ;;  %v1925_v5 = vld [vmem:[%s2392_s5 + $0xb0] sm:$0xff] }
  0x22   : > { %602 = vmatpush.bf16.msra.mxu2 %v1913_v41  ;;  %v1934_v41 = vld [vmem:[%s2392_s5 + $0xf8] sm:$0xff] }
  0x24   : > { %442 = vmatpush.bf16.msra.mxu0 %v1904_v6 }
  0x26   : > { %603 = vmatpush.bf16.msra.mxu2 %v1912_v42 }
  0x28   : > { %443 = vmatpush.bf16.msra.mxu0 %v1903_v7 }
  0x2a   : > { %604 = vmatpush.bf16.msra.mxu2 %v1911_v43 }
  0x2b   : > { %444 = vmatmul.bf16.vlgmr.msra.gmra.mxu0 %v366_v10 }
  0x2c   : > { %845 = vmatpush.bf16.msrb.mxu0 %v1934_v41 }
  0x3b   : > { %449 = vmatmul.bf16.gmra.mxu0 %v367_v13 }
  0x82   : > { %v2136_v44 = vpop.permute.xlu0 %499 }
  0x83   : > { %v2144_v53 = vpop.permute.xlu1 %509 }
  0x8a   : > { %v2139_v47 = vpop.permute.xlu0 %504 }
  0x8b   : > { %v2147_v56 = vpop.permute.xlu1 %514 }
  0xa8   : > { %v445_v14 = vpop.f32.mrf.mxu0 }
  0xa9   : > { %v446_v28 = vadd.f32 %v1986_v20, %v445_v14 }
  0xab   : > { %v455_v35 = vmax.f32 %v446_v28, 0.0 }
  0xb0   : > { %v447_v17 = vpop.f32.mrf.mxu0 }
  0xb1   : > { %v448_v26 = vadd.f32 %v1986_v20, %v447_v17  ;;  %v1922_v17 = vld [vmem:[%s2392_s5 + $0x98] sm:$0xff] }
  0xb3   : > { %v456_v33 = vmax.f32 %v448_v26, 0.0 }
  0xb5   : > { %v459_v36 = vpack.c.bf16 %v456_v33, %v455_v35 }
  0xb8   : > { %v450_v19 = vpop.f32.mrf.mxu0 }
  0xb9   : > { %v451_v23 = vadd.f32 %v1986_v20, %v450_v19  ;;  %v1920_v19 = vld [vmem:[%s2392_s5 + $0x88] sm:$0xff] }
  0xbb   : > { %v457_v29 = vmax.f32 %v451_v23, 0.0 }
  0xc0   : > { %v452_v24 = vpop.f32.mrf.mxu0 }
  0xc1   : > { %v453_v27 = vadd.f32 %v1986_v20, %v452_v24  ;;  %v1919_v20 = vld [vmem:[%s2392_s5 + $0x80] sm:$0xff] }
  0xc3   : > { %v458_v30 = vmax.f32 %v453_v27, 0.0 }
  0xc5   : > { %v460_v34 = vpack.c.bf16 %v458_v30, %v457_v29 }
  0xc7   : > { %484 = vmatpush.bf16.msra.mxu1 %v460_v34 }
  0xcb   : > { %485 = vmatpush.bf16.msra.mxu1 %v459_v36 }
  0xce   : > { %1495 = vmatmul.msk.bf16.vlgmr.msra.gmra.mxu1 %vm471_vm0, %v2113_v37 }
  0xcf   : > { %721 = vmatpush.bf16.msrb.mxu1 %v1926_v2 }
  0xd3   : > { %722 = vmatpush.bf16.msrb.mxu1 %v1925_v5 }
  0xde   : > { %1496 = vmatmul.msk.bf16.gmra.mxu1 %vm471_vm0, %v2117_v38 }
 0x14b   : > { %v487_v45 = vpop.f32.mrf.mxu1 }
 0x14c   : > { %v517_v46 = vmul.f32 %v2136_v44, %v487_v45  ;;  %v1933_v45 = vld [vmem:[%s2392_s5 + $0xf0] sm:$0xff] }
 0x14d   : > { %846 = vmatpush.bf16.msrb.mxu0 %v1933_v45 }
 0x14e   : > { %v521_v50 = vadd.f32 %v517_v46, %v2082_v8 }
 0x153   : > { %v489_v48 = vpop.f32.mrf.mxu1 }
 0x154   : > { %v518_v49 = vmul.f32 %v2139_v47, %v489_v48 }
 0x156   : > { %v522_v51 = vadd.f32 %v518_v49, %v2084_v9 }
 0x158   : > { %v525_v52 = vpack.c.bf16 %v522_v51, %v521_v50 }
 0x15a   : > { %605 = vmatmul.bf16.vlgmr.msra.gmra.mxu2 %v525_v52  ;;  %v1932_v52 = vld [vmem:[%s2392_s5 + $0xe8] sm:$0xff] }
 0x15b   : > { %v492_v54 = vpop.f32.mrf.mxu1  ;;  %847 = vmatpush.bf16.msrb.mxu0 %v1932_v52  ;;  %v1948_v52 = vld [vmem:[%s2392_s5 + $0x168] sm:$0xff] }
 0x15c   : > { %v519_v55 = vmul.f32 %v2144_v53, %v492_v54 }
 0x15e   : > { %v523_v59 = vadd.f32 %v519_v55, %v2088_v11  ;;  %v1924_v11 = vld [vmem:[%s2392_s5 + $0xa8] sm:$0xff] }
 0x15f   : > { %723 = vmatpush.bf16.msrb.mxu1 %v1924_v11 }
 0x163   : > { %v494_v57 = vpop.f32.mrf.mxu1  ;;  %724 = vmatpush.bf16.msrb.mxu1 %v1923_v15 }
 0x164   : > { %v520_v58 = vmul.f32 %v2147_v56, %v494_v57 }
 0x166   : > { %v524_v60 = vadd.f32 %v520_v58, %v2090_v12  ;;  %v1931_v58 = vld [vmem:[%s2392_s5 + $0xe0] sm:$0xff] }
 0x167   : > { %725 = vmatpush.bf16.msrb.mxu1 %v1922_v17  ;;  %848 = vmatpush.bf16.msrb.mxu0 %v1931_v58  ;;  %v1989_v17 = vld [vmem:[%s2393_s6 + $0x3] ss:$0 sm:$0xff] }
 0x168   : > { %v526_v61 = vpack.c.bf16 %v524_v60, %v523_v59  ;;  %v365_v58 = vld [vmem:[%s346_s16] sm:$0xf] }
 0x16a   : > { %610 = vmatmul.bf16.gmra.mxu2 %v526_v61  ;;  %v1929_v61 = vld [vmem:[%s2392_s5 + $0xd0] sm:$0xff] }
 0x16b   : > { %726 = vmatpush.bf16.msrb.mxu1 %v1921_v18 }
 0x16f   : > { %727 = vmatpush.bf16.msrb.mxu1 %v1920_v19 }
 0x173   : > { %728 = vmatpush.bf16.msrb.mxu1 %v1919_v20 }
 0x1dd   : > { %v606_v62 = vpop.f32.mrf.mxu2 }
 0x1de   : > { %v607_v8 = vadd.f32 %v1987_v1, %v606_v62  ;;  %v1928_v62 = vld [vmem:[%s2392_s5 + $0xc8] sm:$0xff] }
 0x1e0   : > { %v616_v14 = vmax.f32 %v607_v8, 0.0 }
 0x1e5   : > { %v608_v63 = vpop.f32.mrf.mxu2 }
 0x1e6   : > { %v609_v6 = vadd.f32 %v1987_v1, %v608_v63  ;;  %v1927_v63 = vld [vmem:[%s2392_s5 + $0xc0] sm:$0xff] }
 0x1e8   : > { %v617_v12 = vmax.f32 %v609_v6, 0.0 }
 0x1ea   : > { %v620_v16 = vpack.c.bf16 %v617_v12, %v616_v14 }
 0x1ed   : > { %v611_v0 = vpop.f32.mrf.mxu2 }
 0x1ee   : > { %v612_v3 = vadd.f32 %v1987_v1, %v611_v0 }
 0x1f0   : > { %v618_v9 = vmax.f32 %v612_v3, 0.0 }
 0x1f5   : > { %v613_v4 = vpop.f32.mrf.mxu2 }
 0x1f6   : > { %v614_v7 = vadd.f32 %v1987_v1, %v613_v4 }
 0x1f8   : > { %v619_v10 = vmax.f32 %v614_v7, 0.0 }
 0x1fa   : > { %v621_v13 = vpack.c.bf16 %v619_v10, %v618_v9 }
 0x1fc   : > { %628 = vmatpush.bf16.msra.mxu3 %v621_v13 }
 0x200   : > { %629 = vmatpush.bf16.msra.mxu3 %v620_v16 }
 0x203   : > { %1546 = vmatmul.msk.bf16.vlgmr.msra.gmra.mxu3 %vm471_vm0, %v2113_v37 }
 0x213   : > { %1547 = vmatmul.msk.bf16.gmra.mxu3 %vm471_vm0, %v2117_v38 }
 0x286   : > { %v631_v21 = vpop.f32.mrf.mxu3 }
 0x287   : > { %v641_v22 = vmul.f32 %v631_v21, %v2136_v44 }
 0x289   : > { %v645_v25 = vadd.f32 %v641_v22, %v521_v50 }
 0x28e   : > { %v633_v23 = vpop.f32.mrf.mxu3 }
 0x28f   : > { %v642_v24 = vmul.f32 %v633_v23, %v2139_v47 }
 0x291   : > { %v646_v26 = vadd.f32 %v642_v24, %v522_v51 }
 0x293   : > { %v649_v27 = vpack.c.bf16 %v646_v26, %v645_v25 }
 0x295   : > { %729 = vmatmul.bf16.vlgmr.msrb.gmra.mxu1 %v649_v27 }
 0x296   : > { %v636_v28 = vpop.f32.mrf.mxu3 }
 0x297   : > { %v643_v29 = vmul.f32 %v636_v28, %v2144_v53 }
 0x299   : > { %v647_v32 = vadd.f32 %v643_v29, %v523_v59 }
 0x29e   : > { %v638_v30 = vpop.f32.mrf.mxu3 }
 0x29f   : > { %v644_v31 = vmul.f32 %v638_v30, %v2147_v56  ;;  %v1942_v30 = vld [vmem:[%s2392_s5 + $0x138] sm:$0xff] }
 0x2a1   : > { %v648_v33 = vadd.f32 %v644_v31, %v524_v60  ;;  %v1930_v60 = vld [vmem:[%s2392_s5 + $0xd8] sm:$0xff] }
 0x2a2   : > { %849 = vmatpush.bf16.msrb.mxu0 %v1930_v60 }
 0x2a3   : > { %v650_v34 = vpack.c.bf16 %v648_v33, %v647_v32 }
 0x2a5   : > { %734 = vmatmul.bf16.gmra.mxu1 %v650_v34  ;;  %v1938_v34 = vld [vmem:[%s2392_s5 + $0x118] sm:$0xff] }
 0x2a6   : > { %850 = vmatpush.bf16.msrb.mxu0 %v1929_v61 }
 0x2aa   : > { %851 = vmatpush.bf16.msrb.mxu0 %v1928_v62 }
 0x2ae   : > { %852 = vmatpush.bf16.msrb.mxu0 %v1927_v63  ;;  %v1944_v63 = vld [vmem:[%s2392_s5 + $0x148] sm:$0xff] }
 0x312   : > { %v730_v35 = vpop.f32.mrf.mxu1 }
 0x313   : > { %v731_v49 = vadd.f32 %v1988_v40, %v730_v35 }
 0x315   : > { %v740_v57 = vmax.f32 %v731_v49, 0.0 }
 0x31a   : > { %v732_v36 = vpop.f32.mrf.mxu1 }
 0x31b   : > { %v733_v46 = vadd.f32 %v1988_v40, %v732_v36 }
 0x31d   : > { %v741_v54 = vmax.f32 %v733_v46, 0.0  ;;  %v1936_v46 = vld [vmem:[%s2392_s5 + $0x108] sm:$0xff] }
 0x31f   : > { %v744_v59 = vpack.c.bf16 %v741_v54, %v740_v57  ;;  %v1947_v54 = vld [vmem:[%s2392_s5 + $0x160] sm:$0xff]  ;;  %v1945_v57 = vld [vmem:[%s2392_s5 + $0x150] sm:$0xff] }
 0x322   : > { %v735_v39 = vpop.f32.mrf.mxu1 }
 0x323   : > { %v736_v42 = vadd.f32 %v1988_v40, %v735_v39  ;;  %v1937_v39 = vld [vmem:[%s2392_s5 + $0x110] sm:$0xff] }
 0x325   : > { %v742_v50 = vmax.f32 %v736_v42, 0.0 }
 0x32a   : > { %v737_v43 = vpop.f32.mrf.mxu1 }
 0x32b   : > { %v738_v48 = vadd.f32 %v1988_v40, %v737_v43 }
 0x32d   : > { %v743_v51 = vmax.f32 %v738_v48, 0.0 }
 0x32f   : > { %v745_v55 = vpack.c.bf16 %v743_v51, %v742_v50  ;;  %v1950_v50 = vld [vmem:[%s2392_s5 + $0x178] sm:$0xff]  ;;  %v1949_v51 = vld [vmem:[%s2392_s5 + $0x170] sm:$0xff] }
 0x330   : > { %1071 = vmatpush.bf16.msra.mxu0 %v1950_v50 }
 0x331   : > { %752 = vmatpush.bf16.msrb.mxu3 %v745_v55  ;;  %v1946_v55 = vld [vmem:[%s2392_s5 + $0x158] sm:$0xff] }
 0x334   : > { %1072 = vmatpush.bf16.msra.mxu0 %v1949_v51 }
 0x335   : > { %753 = vmatpush.bf16.msrb.mxu3 %v744_v59 }
 0x338   : > { %1597 = vmatmul.msk.bf16.vlgmr.msrb.gmra.mxu3 %vm471_vm0, %v2113_v37  ;;  %1073 = vmatpush.bf16.msra.mxu0 %v1948_v52 }
 0x339   : > { %986 = vmatpush.bf16.msra.mxu3 %v1942_v30  ;;  %v1973_v30 = vld [vmem:[%s2392_s5 + $0x230] sm:$0xff] }
 0x33c   : > { %1074 = vmatpush.bf16.msra.mxu0 %v1947_v54 }
 0x340   : > { %1075 = vmatpush.bf16.msra.mxu0 %v1946_v55 }
 0x344   : > { %1076 = vmatpush.bf16.msra.mxu0 %v1945_v57 }
 0x348   : > { %1598 = vmatmul.msk.bf16.gmra.mxu3 %vm471_vm0, %v2117_v38  ;;  %1077 = vmatpush.bf16.msra.mxu0 %v1944_v63 }
 0x3bb   : > { %v755_v0 = vpop.f32.mrf.mxu3 }
 0x3bc   : > { %v765_v1 = vmul.f32 %v755_v0, %v2136_v44  ;;  %v1943_v0 = vld [vmem:[%s2392_s5 + $0x140] sm:$0xff] }
 0x3bd   : > { %1078 = vmatpush.bf16.msra.mxu0 %v1943_v0 }
 0x3be   : > { %v769_v4 = vadd.f32 %v765_v1, %v645_v25  ;;  %v1958_v1 = vld [vmem:[%s2392_s5 + $0x1b8] sm:$0xff] }
 0x3c3   : > { %v757_v2 = vpop.f32.mrf.mxu3 }
 0x3c4   : > { %v766_v3 = vmul.f32 %v757_v2, %v2139_v47  ;;  %v1957_v2 = vld [vmem:[%s2392_s5 + $0x1b0] sm:$0xff] }
 0x3c6   : > { %v770_v5 = vadd.f32 %v766_v3, %v646_v26  ;;  %v1956_v3 = vld [vmem:[%s2392_s5 + $0x1a8] sm:$0xff] }
 0x3c8   : > { %v773_v6 = vpack.c.bf16 %v770_v5, %v769_v4 }
 0x3ca   : > { %853 = vmatmul.bf16.vlgmr.msrb.gmra.mxu0 %v773_v6  ;;  %v1953_v6 = vld [vmem:[%s2392_s5 + $0x190] sm:$0xff] }
 0x3cb   : > { %v760_v7 = vpop.f32.mrf.mxu3 }
 0x3cc   : > { %v767_v8 = vmul.f32 %v760_v7, %v2144_v53  ;;  %v1990_v7 = vld [vmem:[%s2393_s6 + $0x4] ss:$0 sm:$0xff] }
 0x3ce   : > { %v771_v11 = vadd.f32 %v767_v8, %v647_v32  ;;  %v1941_v32 = vld [vmem:[%s2392_s5 + $0x130] sm:$0xff] }
 0x3cf   : > { %987 = vmatpush.bf16.msra.mxu3 %v1941_v32  ;;  %v1971_v32 = vld [vmem:[%s2392_s5 + $0x220] sm:$0xff] }
 0x3d3   : > { %v762_v9 = vpop.f32.mrf.mxu3 }
 0x3d4   : > { %v768_v10 = vmul.f32 %v762_v9, %v2147_v56 }
 0x3d6   : > { %v772_v12 = vadd.f32 %v768_v10, %v648_v33  ;;  %v1940_v33 = vld [vmem:[%s2392_s5 + $0x128] sm:$0xff] }
 0x3d7   : > { %988 = vmatpush.bf16.msra.mxu3 %v1940_v33  ;;  %v1970_v33 = vld [vmem:[%s2392_s5 + $0x218] sm:$0xff] }
 0x3d8   : > { %v774_v13 = vpack.c.bf16 %v772_v12, %v771_v11 }
 0x3da   : > { %858 = vmatmul.bf16.gmra.mxu0 %v774_v13  ;;  %v1952_v13 = vld [vmem:[%s2392_s5 + $0x188] sm:$0xff] }
 0x447   : > { %v854_v14 = vpop.f32.mrf.mxu0 }
 0x448   : > { %v855_v22 = vadd.f32 %v1989_v17, %v854_v14  ;;  %v1951_v14 = vld [vmem:[%s2392_s5 + $0x180] sm:$0xff] }
 0x44a   : > { %v864_v27 = vmax.f32 %v855_v22, 0.0 }
 0x44f   : > { %v856_v15 = vpop.f32.mrf.mxu0 }
 0x450   : > { %v857_v20 = vadd.f32 %v1989_v17, %v856_v15  ;;  %v1966_v15 = vld [vmem:[%s2392_s5 + $0x1f8] sm:$0xff] }
 0x452   : > { %v865_v25 = vmax.f32 %v857_v20, 0.0  ;;  %v1961_v20 = vld [vmem:[%s2392_s5 + $0x1d0] sm:$0xff] }
 0x454   : > { %v868_v28 = vpack.c.bf16 %v865_v25, %v864_v27  ;;  %v1960_v27 = vld [vmem:[%s2392_s5 + $0x1c8] sm:$0xff] }
 0x457   : > { %v859_v16 = vpop.f32.mrf.mxu0 }
 0x458   : > { %v860_v18 = vadd.f32 %v1989_v17, %v859_v16  ;;  %v1965_v16 = vld [vmem:[%s2392_s5 + $0x1f0] sm:$0xff] }
 0x45a   : > { %v866_v23 = vmax.f32 %v860_v18, 0.0  ;;  %v1963_v18 = vld [vmem:[%s2392_s5 + $0x1e0] sm:$0xff] }
 0x45f   : > { %v861_v19 = vpop.f32.mrf.mxu0 }
 0x460   : > { %v862_v21 = vadd.f32 %v1989_v17, %v861_v19  ;;  %v1964_v17 = vld [vmem:[%s2392_s5 + $0x1e8] sm:$0xff]  ;;  %v1962_v19 = vld [vmem:[%s2392_s5 + $0x1d8] sm:$0xff] }
 0x462   : > { %v867_v24 = vmax.f32 %v862_v21, 0.0  ;;  %v1991_v21 = vld [vmem:[%s2393_s6 + $0x5] ss:$0 sm:$0xff] }
 0x464   : > { %v869_v26 = vpack.c.bf16 %v867_v24, %v866_v23 }
 0x466   : > { %876 = vmatpush.bf16.msrb.mxu2 %v869_v26 }
 0x46a   : > { %877 = vmatpush.bf16.msrb.mxu2 %v868_v28  ;;  %v1959_v28 = vld [vmem:[%s2392_s5 + $0x1c0] sm:$0xff] }
 0x46d   : > { %1648 = vmatmul.msk.bf16.vlgmr.msrb.gmra.mxu2 %vm471_vm0, %v2113_v37 }
 0x46e   : > { %1156 = vmatpush.bf16.msra.mxu2 %v1958_v1 }
 0x472   : > { %1157 = vmatpush.bf16.msra.mxu2 %v1957_v2 }
 0x476   : > { %1158 = vmatpush.bf16.msra.mxu2 %v1956_v3 }
 0x47d   : > { %1649 = vmatmul.msk.bf16.gmra.mxu2 %vm471_vm0, %v2117_v38  ;;  %v1939_v38 = vld [vmem:[%s2392_s5 + $0x120] sm:$0xff] }
 0x47e   : > { %989 = vmatpush.bf16.msra.mxu3 %v1939_v38  ;;  %v1992_v38 = vld [vmem:[%s2393_s6 + $0x6] ss:$0 sm:$0xff] }
 0x482   : > { %990 = vmatpush.bf16.msra.mxu3 %v1938_v34 }
 0x486   : > { %991 = vmatpush.bf16.msra.mxu3 %v1937_v39 }
 0x48a   : > { %992 = vmatpush.bf16.msra.mxu3 %v1936_v46 }
 0x4f0   : > { %v879_v29 = vpop.f32.mrf.mxu2 }
 0x4f1   : > { %v889_v42 = vmul.f32 %v879_v29, %v2136_v44  ;;  %v364_v44 = vld [vmem:[%s342_s19] sm:$0x3]  ;;  %v1974_v29 = vld [vmem:[%s2392_s5 + $0x238] sm:$0xff] }
 0x4f3   : > { %v893_v49 = vadd.f32 %v889_v42, %v769_v4  ;;  %v1955_v4 = vld [vmem:[%s2392_s5 + $0x1a0] sm:$0xff] }
 0x4f4   : > { %1159 = vmatpush.bf16.msra.mxu2 %v1955_v4  ;;  %v1967_v42 = vld [vmem:[%s2392_s5 + $0x200] sm:$0xff] }
 0x4f8   : > { %v881_v31 = vpop.f32.mrf.mxu2 }
 0x4f9   : > { %v890_v40 = vmul.f32 %v881_v31, %v2139_v47  ;;  %v1972_v31 = vld [vmem:[%s2392_s5 + $0x228] sm:$0xff] }
 0x500   : > { %v884_v37 = vpop.f32.mrf.mxu2 }
 0x501   : > { %v891_v35 = vmul.f32 %v884_v37, %v2144_v53  ;;  %v894_v53 = vadd.f32 %v890_v40, %v770_v5  ;;  %v1954_v5 = vld [vmem:[%s2392_s5 + $0x198] sm:$0xff]  ;;  %v1969_v37 = vld [vmem:[%s2392_s5 + $0x210] sm:$0xff] }
 0x502   : > { %1160 = vmatpush.bf16.msra.mxu2 %v1954_v5 }
 0x503   : > { %v895_v43 = vadd.f32 %v891_v35, %v771_v11  ;;  %v897_v47 = vpack.c.bf16 %v894_v53, %v893_v49 }
 0x506   : > { %1161 = vmatpush.bf16.msra.mxu2 %v1953_v6 }
 0x508   : > { %v886_v36 = vpop.f32.mrf.mxu2 }
 0x509   : > { %v892_v41 = vmul.f32 %v886_v36, %v2147_v56  ;;  %v1935_v56 = vld [vmem:[%s2392_s5 + $0x100] sm:$0xff] }
 0x50a   : > { %993 = vmatpush.bf16.msra.mxu3 %v1935_v56  ;;  %1162 = vmatpush.bf16.msra.mxu2 %v1952_v13 }
 0x50b   : > { %v896_v45 = vadd.f32 %v892_v41, %v772_v12  ;;  %v1968_v41 = vld [vmem:[%s2392_s5 + $0x208] sm:$0xff] }
 0x50d   : > { %v898_v48 = vpack.c.bf16 %v896_v45, %v895_v43  ;;  %v1993_v43 = vld [vmem:[%s2393_s6 + $0x7] ss:$0 sm:$0xff] }
 0x50e   : > { %1163 = vmatpush.bf16.msra.mxu2 %v1951_v14  ;;  %1326 = vmatpush.bf16.msrb.mxu3 %v1974_v29 }
 0x50f   : > { %908 = vmatpush.bf16.msra.mxu1 %v898_v48 }
 0x512   : > { %1327 = vmatpush.bf16.msrb.mxu3 %v1973_v30 }
 0x513   : > { %909 = vmatpush.bf16.msra.mxu1 %v897_v47  ;;  %v1994_v47 = vld [vmem:[%s2393_s6 + $0x8] ss:$0 sm:$0xff] }
 0x516   : > { %1650 = vmatmul.msk.bf16.vlgmr.msra.gmra.mxu1 %vm471_vm0, %v364_v44  ;;  %1328 = vmatpush.bf16.msrb.mxu3 %v1972_v31 }
 0x517   : > { %1241 = vmatpush.bf16.msrb.mxu1 %v1966_v15 }
 0x51a   : > { %1329 = vmatpush.bf16.msrb.mxu3 %v1971_v32 }
 0x51b   : > { %1242 = vmatpush.bf16.msrb.mxu1 %v1965_v16 }
 0x51e   : > { %1330 = vmatpush.bf16.msrb.mxu3 %v1970_v33 }
 0x51f   : > { %1243 = vmatpush.bf16.msrb.mxu1 %v1964_v17 }
 0x522   : > { %1331 = vmatpush.bf16.msrb.mxu3 %v1969_v37 }
 0x523   : > { %1244 = vmatpush.bf16.msrb.mxu1 %v1963_v18 }
 0x526   : > { %1332 = vmatpush.bf16.msrb.mxu3 %v1968_v41 }
 0x527   : > { %1245 = vmatpush.bf16.msrb.mxu1 %v1962_v19 }
 0x52a   : > { %1333 = vmatpush.bf16.msrb.mxu3 %v1967_v42 }
 0x52b   : > { %1246 = vmatpush.bf16.msrb.mxu1 %v1961_v20 }
 0x52f   : > { %1247 = vmatpush.bf16.msrb.mxu1 %v1960_v27 }
 0x533   : > { %1248 = vmatpush.bf16.msrb.mxu1 %v1959_v28 }
 0x593   : > { %v911_v59 = vpop.f32.mrf.mxu1 }
 0x594   : > { %v912_v60 = vadd.f32 %v911_v59, %v365_v58 }
 0x596   : > { %v915_v61 = vpack.c.bf16 %v912_v60, %v912_v60 }
 0x598   : > { %994 = vmatmul.bf16.vlgmr.msra.gmra.mxu3 %v915_v61 }
 0x59b   : > { %v913_v62 = vpop.f32.mrf.mxu1 }
 0x61b   : > { %v995_v8 = vpop.f32.mrf.mxu3 }
 0x61c   : > { %v996_v9 = vadd.f32 %v1990_v7, %v995_v8 }
 0x61e   : > { %v999_v10 = vmax.f32 %v996_v9, 0.0 }
 0x620   : > { %v1000_v11 = vpack.c.bf16 %v999_v10, %v999_v10 }
 0x622   : > { %1079 = vmatmul.bf16.vlgmr.msra.gmra.mxu0 %v1000_v11 }
 0x623   : > { %v997_v12 = vpop.f32.mrf.mxu3 }
 0x69f   : > { %v1080_v22 = vpop.f32.mrf.mxu0 }
 0x6a0   : > { %v1081_v23 = vadd.f32 %v1991_v21, %v1080_v22 }
 0x6a2   : > { %v1084_v24 = vmax.f32 %v1081_v23, 0.0 }
 0x6a4   : > { %v1085_v25 = vpack.c.bf16 %v1084_v24, %v1084_v24 }
 0x6a6   : > { %1164 = vmatmul.bf16.vlgmr.msra.gmra.mxu2 %v1085_v25 }
 0x6a7   : > { %v1082_v26 = vpop.f32.mrf.mxu0 }
 0x729   : > { %v1165_v34 = vpop.f32.mrf.mxu2 }
 0x72a   : > { %v1166_v35 = vadd.f32 %v1992_v38, %v1165_v34 }
 0x72c   : > { %v1169_v36 = vmax.f32 %v1166_v35, 0.0 }
 0x72e   : > { %v1170_v39 = vpack.c.bf16 %v1169_v36, %v1169_v36 }
 0x730   : > { %1249 = vmatmul.bf16.vlgmr.msrb.gmra.mxu1 %v1170_v39 }
 0x731   : > { %v1167_v40 = vpop.f32.mrf.mxu2 }
 0x7ad   : > { %v1250_v45 = vpop.f32.mrf.mxu1 }
 0x7ae   : > { %v1251_v46 = vadd.f32 %v1993_v43, %v1250_v45 }
 0x7b0   : > { %v1254_v53 = vmax.f32 %v1251_v46, 0.0 }
 0x7b2   : > { %v1255_v48 = vpack.c.bf16 %v1254_v53, %v1254_v53 }
 0x7b4   : > { %1334 = vmatmul.bf16.vlgmr.msrb.gmra.mxu3 %v1255_v48 }
 0x7b5   : > { %v1252_v49 = vpop.f32.mrf.mxu1 }
 0x837   : > { %v1335_v44 = vpop.f32.mrf.mxu3 }
 0x838   : > { %v1336_v56 = vadd.f32 %v1994_v47, %v1335_v44 }
 0x83a   : > { %1339 = vst [vmem:[%s350_s21] sm:$0xf] %v1336_v56 }
 0x83f   : > { %v1337_v50 = vpop.f32.mrf.mxu3 }
 0x840 PF: > { %s17_s24 = sadd.s32 1, %s2001_s24  }
 0x841   : > { %p14_p4 = scmp.ge.s32.totalorder %s17_s24, 5  }
 0x843   :  { %16 = sbr.rel (!%p14_p4) target bundleno = 1 (0x1), region = 106 }

</bundles_post_ra>
